<compile_context>
chip_gen: v7x
topology: tpu7x:2x2x1
jax: 0.10.0
libtpu: 0.0.40
codegen_flags: <defaults>
</compile_context>

<pallas_src>
import jax
import jax.numpy as jnp
from jax.experimental import pallas as pl
from jax.experimental.pallas import tpu as pltpu


def _round_up(x, m):
    return (x + m - 1) // m * m


def reward_mlp_kernel(x_ref, w1_ref, b1_ref, w2_ref, b2_ref, w3_ref, b3_ref,
                      o_ref):
    # Hidden matmuls on the MXU (bf16 inputs, f32 accumulate); bias + ReLU on
    # the VPU in f32.
    x = x_ref[...].astype(jnp.bfloat16)                              # (TB, Sp)
    h1 = jnp.dot(x, w1_ref[...], preferred_element_type=jnp.float32)
    h1 = jnp.maximum(h1 + b1_ref[...], 0.0)                          # (TB, Hp) f32
    h2 = jnp.dot(h1.astype(jnp.bfloat16), w2_ref[...],
                 preferred_element_type=jnp.float32)
    h2 = jnp.maximum(h2 + b2_ref[...], 0.0)                          # (TB, Hp) f32
    # Final (Hp -> 1) projection: VPU mul + lane reduction. Avoids an N=1 MXU
    # matmul (wastes >= 127/128 of MXU output width) and keeps the MXU free.
    r = jnp.sum(h2 * w3_ref[...], axis=-1, keepdims=True)            # (TB, 1)
    o_ref[...] = r + b3_ref[...]


def reward_model_forward(state, params, *, tile_b=512):
    """state: (B, state_dim) float32. Returns (B, 1) float32."""
    w1, b1, w2, b2, w3, b3 = params
    B, S = state.shape
    H = w1.shape[1]

    # --- host-side layout prep (exact math; zero padding) --------------------
    Sp = _round_up(S, 128)                     # lane-width padded feature dims
    Hp = _round_up(H, 128)
    TILE_B = min(tile_b, _round_up(B, 8))      # multiple of 8 (f32 sublane)
    Bp = _round_up(B, TILE_B)

    x = jnp.pad(state.astype(jnp.float32), ((0, Bp - B), (0, Sp - S)))
    w1p = jnp.pad(w1, ((0, Sp - S), (0, Hp - H))).astype(jnp.bfloat16)
    b1p = jnp.pad(b1.astype(jnp.float32), ((0, 0), (0, Hp - H)))
    # TODO(synk): for hidden_dim large enough that bf16 W2 no longer fits the
    # v7x 64 MiB VMEM budget, switch to a K-tiled reduction grid with an f32
    # VMEM accumulator (reduction axis last, pl.when init/finalize).
    w2p = jnp.pad(w2, ((0, Hp - H), (0, Hp - H))).astype(jnp.bfloat16)
    b2p = jnp.pad(b2.astype(jnp.float32), ((0, 0), (0, Hp - H)))
    w3row = jnp.pad(w3.astype(jnp.float32), ((0, Hp - H), (0, 0))).T   # (1, Hp)
    b3p = b3.astype(jnp.float32).reshape(1, 1)

    grid = (Bp // TILE_B,)

    def const(shape):
        return pl.BlockSpec(shape, lambda i: (0,) * len(shape))

    flops = 2 * Bp * (Sp * Hp + Hp * Hp + Hp)
    bytes_accessed = (x.size * 4 + w1p.size * 2 + w2p.size * 2
                      + (b1p.size + b2p.size + w3row.size + b3p.size) * 4
                      + Bp * 4)

    out = pl.pallas_call(
        reward_mlp_kernel,
        out_shape=jax.ShapeDtypeStruct((Bp, 1), jnp.float32),
        grid=grid,
        in_specs=[
            pl.BlockSpec((TILE_B, Sp), lambda i: (i, 0)),   # activation tile
            const((Sp, Hp)), const((1, Hp)),                # w1, b1 (VMEM resident)
            const((Hp, Hp)), const((1, Hp)),                # w2, b2 (VMEM resident)
            const((1, Hp)), const((1, 1)),                  # w3 row, b3
        ],
        out_specs=pl.BlockSpec((TILE_B, 1), lambda i: (i, 0)),
        compiler_params=pltpu.CompilerParams(
            dimension_semantics=("parallel",),              # megacore on v7x
            vmem_limit_bytes=48 << 20,                      # headroom on 64 MiB v7x
        ),
        cost_estimate=pl.CostEstimate(
            flops=flops, transcendentals=0, bytes_accessed=bytes_accessed),
    )(x, w1p, b1p, w2p, b2p, w3row, b3p)

    return out[:B]


def init_params(key, state_dim, hidden_dim):
    """Deterministic init matching PyTorch nn.Linear shapes (stored transposed)."""
    ks = jax.random.split(key, 6)

    def lin(kw, kb, fan_in, fan_out):
        bound = 1.0 / jnp.sqrt(fan_in)
        w = jax.random.uniform(kw, (fan_in, fan_out), jnp.float32, -bound, bound)
        b = jax.random.uniform(kb, (1, fan_out), jnp.float32, -bound, bound)
        return w, b

    w1, b1 = lin(ks[0], ks[1], state_dim, hidden_dim)
    w2, b2 = lin(ks[2], ks[3], hidden_dim, hidden_dim)
    w3, b3 = lin(ks[4], ks[5], hidden_dim, 1)
    return (w1, b1, w2, b2, w3, b3)


def reference_forward(state, params):
    w1, b1, w2, b2, w3, b3 = params
    h1 = jnp.maximum(state @ w1 + b1, 0.0)
    h2 = jnp.maximum(h1 @ w2 + b2, 0.0)
    return h2 @ w3 + b3


if __name__ == "__main__":
    key = jax.random.PRNGKey(0)
    k_state, k_params = jax.random.split(key)

    batch = 8
    state_dim = 16
    hidden_dim = 32

    state = jax.random.normal(k_state, (batch, state_dim), jnp.float32)
    params = init_params(k_params, state_dim, hidden_dim)

    out = reward_model_forward(state, params)
    out = jax.block_until_ready(out)

    ref = reference_forward(state, params)
    assert out.shape == (batch, 1)
    # bf16 MXU inputs (f32 accumulate) vs pure-f32 reference -> relaxed tol.
    assert jnp.allclose(out, ref, atol=2e-2, rtol=2e-2)

    print("KERNEL_OK")
</pallas_src>

<mosaic_0001>
module attributes {stable_mosaic.version = 11 : i64} {
  func.func @reward_mlp_kernel(%arg0: i32, %arg1: memref<8x128xf32, #tpu.memory_space<vmem>>, %arg2: memref<128x128xbf16, #tpu.memory_space<vmem>>, %arg3: memref<1x128xf32, #tpu.memory_space<vmem>>, %arg4: memref<128x128xbf16, #tpu.memory_space<vmem>>, %arg5: memref<1x128xf32, #tpu.memory_space<vmem>>, %arg6: memref<1x128xf32, #tpu.memory_space<vmem>>, %arg7: memref<1x1xf32, #tpu.memory_space<vmem>>, %arg8: memref<8x1xf32, #tpu.memory_space<vmem>>) attributes {dimension_semantics = [#tpu.dimension_semantics<parallel>], iteration_bounds = array<i64: 1>, scalar_prefetch = 0 : i64, scratch_operands = 0 : i64, tpu.core_type = #tpu.core_type<tc>, window_params = [{transform_indices = @transform_0, window_bounds = array<i64: 8, 128>}, {pipeline_mode = #tpu.pipeline_mode<synchronous>, transform_indices = @transform_1, window_bounds = array<i64: 128, 128>}, {pipeline_mode = #tpu.pipeline_mode<synchronous>, transform_indices = @transform_2, window_bounds = array<i64: 1, 128>}, {pipeline_mode = #tpu.pipeline_mode<synchronous>, transform_indices = @transform_3, window_bounds = array<i64: 128, 128>}, {pipeline_mode = #tpu.pipeline_mode<synchronous>, transform_indices = @transform_4, window_bounds = array<i64: 1, 128>}, {pipeline_mode = #tpu.pipeline_mode<synchronous>, transform_indices = @transform_5, window_bounds = array<i64: 1, 128>}, {pipeline_mode = #tpu.pipeline_mode<synchronous>, transform_indices = @transform_6, window_bounds = array<i64: 1, 1>}, {transform_indices = @transform_7, window_bounds = array<i64: 8, 1>}]} {
    %c0 = arith.constant 0 : index
    %c0_0 = arith.constant 0 : index
    %0 = vector.load %arg1[%c0, %c0_0] : memref<8x128xf32, #tpu.memory_space<vmem>>, vector<8x128xf32>
    %1 = arith.truncf %0 : vector<8x128xf32> to vector<8x128xbf16>
    %c0_1 = arith.constant 0 : index
    %c0_2 = arith.constant 0 : index
    %2 = vector.load %arg2[%c0_1, %c0_2] : memref<128x128xbf16, #tpu.memory_space<vmem>>, vector<128x128xbf16>
    %cst = arith.constant dense<0.000000e+00> : vector<8x128xf32>
    %3 = tpu.matmul %1, %2, %cst {dimension_numbers = #tpu.dot_dimension_numbers<[1], [0], [0], [1], [0, 0, 1, 1], [], []>} : vector<8x128xbf16>, vector<128x128xbf16>, vector<8x128xf32> -> vector<8x128xf32>
    %c0_3 = arith.constant 0 : index
    %c0_4 = arith.constant 0 : index
    %4 = vector.load %arg3[%c0_3, %c0_4] : memref<1x128xf32, #tpu.memory_space<vmem>>, vector<1x128xf32>
    %5 = vector.broadcast %4 : vector<1x128xf32> to vector<8x128xf32>
    %6 = arith.addf %3, %5 : vector<8x128xf32>
    %cst_5 = arith.constant 0.000000e+00 : f32
    %7 = vector.broadcast %cst_5 : f32 to vector<8x128xf32>
    %8 = arith.maximumf %6, %7 : vector<8x128xf32>
    %9 = arith.truncf %8 : vector<8x128xf32> to vector<8x128xbf16>
    %c0_6 = arith.constant 0 : index
    %c0_7 = arith.constant 0 : index
    %10 = vector.load %arg4[%c0_6, %c0_7] : memref<128x128xbf16, #tpu.memory_space<vmem>>, vector<128x128xbf16>
    %cst_8 = arith.constant dense<0.000000e+00> : vector<8x128xf32>
    %11 = tpu.matmul %9, %10, %cst_8 {dimension_numbers = #tpu.dot_dimension_numbers<[1], [0], [0], [1], [0, 0, 1, 1], [], []>} : vector<8x128xbf16>, vector<128x128xbf16>, vector<8x128xf32> -> vector<8x128xf32>
    %c0_9 = arith.constant 0 : index
    %c0_10 = arith.constant 0 : index
    %12 = vector.load %arg5[%c0_9, %c0_10] : memref<1x128xf32, #tpu.memory_space<vmem>>, vector<1x128xf32>
    %13 = vector.broadcast %12 : vector<1x128xf32> to vector<8x128xf32>
    %14 = arith.addf %11, %13 : vector<8x128xf32>
    %cst_11 = arith.constant 0.000000e+00 : f32
    %15 = vector.broadcast %cst_11 : f32 to vector<8x128xf32>
    %16 = arith.maximumf %14, %15 : vector<8x128xf32>
    %c0_12 = arith.constant 0 : index
    %c0_13 = arith.constant 0 : index
    %17 = vector.load %arg6[%c0_12, %c0_13] : memref<1x128xf32, #tpu.memory_space<vmem>>, vector<1x128xf32>
    %18 = vector.broadcast %17 : vector<1x128xf32> to vector<8x128xf32>
    %19 = arith.mulf %16, %18 : vector<8x128xf32>
    %cst_14 = arith.constant dense<0.000000e+00> : vector<8xf32>
    %20 = vector.multi_reduction <add>, %19, %cst_14 [1] : vector<8x128xf32> to vector<8xf32>
    %21 = vector.shape_cast %20 : vector<8xf32> to vector<8x1xf32>
    %c0_15 = arith.constant 0 : index
    %c0_16 = arith.constant 0 : index
    %22 = vector.load %arg7[%c0_15, %c0_16] : memref<1x1xf32, #tpu.memory_space<vmem>>, vector<1x1xf32>
    %23 = vector.broadcast %22 : vector<1x1xf32> to vector<8x1xf32>
    %24 = arith.addf %21, %23 : vector<8x1xf32>
    %c0_17 = arith.constant 0 : index
    %c0_18 = arith.constant 0 : index
    %25 = vector.load %arg8[%c0_17, %c0_18] : memref<8x1xf32, #tpu.memory_space<vmem>>, vector<8x1xf32>
    tpu.vector_store %arg8[%c0_17, %c0_18], %24 {strides = array<i32>} : memref<8x1xf32, #tpu.memory_space<vmem>>, vector<8x1xf32>,
    return
  }
  func.func @transform_0(%arg0: i32) -> (i32, i32) {
    %c0_i32 = arith.constant 0 : i32
    %c0_i32_0 = arith.constant 0 : i32
    return %arg0, %c0_i32 : i32, i32
  }
  func.func @transform_1(%arg0: i32) -> (i32, i32) {
    %c0_i32 = arith.constant 0 : i32
    %c0_i32_0 = arith.constant 0 : i32
    %c0_i32_1 = arith.constant 0 : i32
    return %c0_i32, %c0_i32_0 : i32, i32
  }
  func.func @transform_2(%arg0: i32) -> (i32, i32) {
    %c0_i32 = arith.constant 0 : i32
    %c0_i32_0 = arith.constant 0 : i32
    %c0_i32_1 = arith.constant 0 : i32
    return %c0_i32, %c0_i32_0 : i32, i32
  }
  func.func @transform_3(%arg0: i32) -> (i32, i32) {
    %c0_i32 = arith.constant 0 : i32
    %c0_i32_0 = arith.constant 0 : i32
    %c0_i32_1 = arith.constant 0 : i32
    return %c0_i32, %c0_i32_0 : i32, i32
  }
  func.func @transform_4(%arg0: i32) -> (i32, i32) {
    %c0_i32 = arith.constant 0 : i32
    %c0_i32_0 = arith.constant 0 : i32
    %c0_i32_1 = arith.constant 0 : i32
    return %c0_i32, %c0_i32_0 : i32, i32
  }
  func.func @transform_5(%arg0: i32) -> (i32, i32) {
    %c0_i32 = arith.constant 0 : i32
    %c0_i32_0 = arith.constant 0 : i32
    %c0_i32_1 = arith.constant 0 : i32
    return %c0_i32, %c0_i32_0 : i32, i32
  }
  func.func @transform_6(%arg0: i32) -> (i32, i32) {
    %c0_i32 = arith.constant 0 : i32
    %c0_i32_0 = arith.constant 0 : i32
    %c0_i32_1 = arith.constant 0 : i32
    return %c0_i32, %c0_i32_0 : i32, i32
  }
  func.func @transform_7(%arg0: i32) -> (i32, i32) {
    %c0_i32 = arith.constant 0 : i32
    %c0_i32_0 = arith.constant 0 : i32
    return %arg0, %c0_i32 : i32, i32
  }
}

</mosaic_0001>

<bundles_post_ra>
// kernel: tpu_custom_call.1
= control target key start
LH: loop header
LB: loop body
LE: loop exit
PB: predicated region body
PF: predicated region fallthrough
CT: control target
= control target key end

     0   :  { %s596_s0 = inlined_call_operand.hbm [shape: f32[8,128], index: 0, kind: input, shape index: {}]   ;;  %s597_s1 = inlined_call_operand.hbm [shape: bf16[128,128], index: 1, kind: input, shape index: {}]   ;;  %s598_s2 = inlined_call_operand.vmem [shape: f32[1,128], index: 2, kind: input, shape index: {}]   ;;  %s599_s3 = inlined_call_operand.hbm [shape: bf16[128,128], index: 3, kind: input, shape index: {}]   ;;  %s600_s4 = inlined_call_operand.vmem [shape: f32[1,128], index: 4, kind: input, shape index: {}]   ;;  %s601_s5 = inlined_call_operand.vmem [shape: f32[1,128], index: 5, kind: input, shape index: {}]   ;;  %s602_s6 = inlined_call_operand.<no memory space> [shape: f32[1,1], index: 6, kind: input, shape index: {}]   ;;  %s603_s7 = inlined_call_operand.vmem [shape: f32[8,1], index: 7, kind: output, shape index: {}]  }
   0x1   :  { %v12_v0 = vstv %s602_s6 }
   0x2   :  { %13 = vst [vmem:[#allocation2] sm:$0x1] %v12_v0 }
   0x3   :  { %14 = vsyncpa [#allocation4], 0 }
   0x4   :  { %15 = vsyncpa [#allocation6], 0  ;;  %s492_s26 = smov [#allocation5]   ;;  %s422_s30 = scalar_lea.hbm %s597_s1, 1024 }
   0x5   :  { %s31_s27 = sshll.u32 %s492_s26, 4  ;;  %p423_p0 = scmp.ne.s32.totalorder %s597_s1, %s422_s30  ;;  %s32_s27 = int_to_ptr.vmem [resolvable:$true] %s31_s27 }
   0x6   :  { %p426_p1 = scmp.lt.u32.totalorder %s422_s30, %s597_s1 }
   0x8   :  { %p428_p2 = pnand %p426_p1, %p423_p0 }
   0xa   :  { %431 = shalt.err (!%p428_p2)
}
   0xb   :  { %s432_s6 = scalar_lea.vmem %s32_s27, 1024  ;;  %p437_p4 = scmp.lt.s32.totalorder %s32_s27, %s32_s27 }
   0xc   :  { %p433_p3 = scmp.ne.s32.totalorder %s32_s27, %s432_s6  ;;  %p438_p5 = scmp.lt.s32.totalorder %s432_s6, %s432_s6 }
   0xe   :  { %p439_p6 = por %p438_p5, %p437_p4 }
  0x10   :  { %p440_p7 = pnand %p439_p6, %p433_p3 }
  0x12   :  { %443 = shalt.err (!%p440_p7)
}
  0x13   :  { %s493_s12 = smov 64   ;;  %s494_s13 = smov 4  }
  0x14   :  { %37 = dma.hbm_to_vmem [thread:$0]  %s597_s1, 1024, %s32_s27, [#allocation6], %s493_s12, %s493_s12, %s494_s13  }
  0x15   :  { %s495_s16 = smov [#allocation3]   ;;  %s496_s18 = smov [#allocation7]  }
  0x16   :  { %s22_s17 = sshll.u32 %s495_s16, 4  ;;  %s45_s19 = sshll.u32 %s496_s18, 4  ;;  %s23_s17 = int_to_ptr.vmem [resolvable:$true] %s22_s17  ;;  %s46_s19 = int_to_ptr.vmem [resolvable:$true] %s45_s19 }
  0x17   :  { %s444_s22 = scalar_lea.hbm %s596_s0, 128 }
  0x18   :  { %p445_p8 = scmp.ne.s32.totalorder %s596_s0, %s444_s22  ;;  %p448_p9 = scmp.lt.u32.totalorder %s444_s22, %s596_s0 }
  0x1a   :  { %p450_p10 = pnand %p448_p9, %p445_p8 }
  0x1c   :  { %453 = shalt.err (!%p450_p10)
}
  0x1d   :  { %s454_s1 = scalar_lea.vmem %s23_s17, 128  ;;  %p459_p12 = scmp.lt.s32.totalorder %s23_s17, %s23_s17 }
  0x1e   :  { %p455_p11 = scmp.ne.s32.totalorder %s23_s17, %s454_s1  ;;  %p460_p13 = scmp.lt.s32.totalorder %s454_s1, %s454_s1 }
  0x20   :  { %p461_p0 = por %p460_p13, %p459_p12 }
  0x22   :  { %p462_p1 = pnand %p461_p0, %p455_p11 }
  0x24   :  { %465 = shalt.err (!%p462_p1)
}
  0x25   :  { %25 = dma.hbm_to_vmem [thread:$0]  %s596_s0, 128, %s23_s17, [#allocation4]  }
  0x26   :  { %s466_s8 = scalar_lea.hbm %s599_s3, 1024 }
  0x27   :  { %p467_p2 = scmp.ne.s32.totalorder %s599_s3, %s466_s8  ;;  %p470_p3 = scmp.lt.u32.totalorder %s466_s8, %s599_s3 }
  0x29   :  { %p472_p4 = pnand %p470_p3, %p467_p2 }
  0x2b   :  { %475 = shalt.err (!%p472_p4)
}
  0x2c   :  { %s476_s14 = scalar_lea.vmem %s46_s19, 1024  ;;  %p481_p6 = scmp.lt.s32.totalorder %s46_s19, %s46_s19 }
  0x2d   :  { %p477_p5 = scmp.ne.s32.totalorder %s46_s19, %s476_s14  ;;  %p482_p7 = scmp.lt.s32.totalorder %s476_s14, %s476_s14 }
  0x2f   :  { %p483_p8 = por %p482_p7, %p481_p6 }
  0x31   :  { %p484_p9 = pnand %p483_p8, %p477_p5 }
  0x33   :  { %487 = shalt.err (!%p484_p9)
}
  0x34   :  { %51 = dma.hbm_to_vmem [thread:$0]  %s599_s3, 1024, %s46_s19, [#allocation6], %s493_s12, %s493_s12, %s494_s13  }
  0x35   :  { %488 = dma.done.wait [#allocation4], 128  }
  0x36   :  { %489 = vsyncadd [#allocation4], 4294967168 }
  0x37   :  { %490 = dma.done.wait [#allocation6], 2048  }
  0x38   :  { %491 = vsyncadd [#allocation6], 4294965248  ;;  %v497_v1 = vmov 0.0   ;;  %vm498_vm0 = vmmov 0   ;;  %v406_v2 = vld [vmem:[#allocation5] sm:$0xff]   ;;  %v407_v3 = vld [vmem:[#allocation5 + $0x8] sm:$0xff]  }
  0x39   :  { %359 = vmatprep.subr.bf16.mxu0 %v497_v1  ;;  %375 = vmatprep.mubr.msk.bf16.mxu0 %vm498_vm0, %v497_v1  ;;  %v408_v4 = vld [vmem:[#allocation5 + $0x10] sm:$0xff]   ;;  %v414_v5 = vld [vmem:[#allocation7] sm:$0xff]   ;;  %v409_v6 = vld [vmem:[#allocation5 + $0x18] sm:$0xff]   ;;  %vm313_vm1 = vcmask 7168  }
  0x3a   :  { %379 = vmatprep.subr.bf16.mxu1 %v497_v1  ;;  %395 = vmatprep.mubr.msk.bf16.mxu1 %vm498_vm0, %v497_v1  ;;  %v415_v7 = vld [vmem:[#allocation7 + $0x8] sm:$0xff]   ;;  %v410_v8 = vld [vmem:[#allocation5 + $0x20] sm:$0xff]   ;;  %v416_v9 = vld [vmem:[#allocation7 + $0x10] sm:$0xff]  }
  0x3b   :  { %360 = vmatpush3.bf16.msra.mxu0 %v406_v2  ;;  %380 = vmatpush3.bf16.msra.mxu1 %v414_v5  ;;  %v411_v10 = vld [vmem:[#allocation5 + $0x28] sm:$0xff]   ;;  %v417_v11 = vld [vmem:[#allocation7 + $0x18] sm:$0xff]   ;;  %v412_v12 = vld [vmem:[#allocation5 + $0x30] sm:$0xff]  }
  0x3c   :  { %361 = vmatprep.subr.bf16.mxu0 %v497_v1  ;;  %381 = vmatprep.subr.bf16.mxu1 %v497_v1  ;;  %v418_v13 = vld [vmem:[#allocation7 + $0x20] sm:$0xff]   ;;  %v413_v14 = vld [vmem:[#allocation5 + $0x38] sm:$0xff]   ;;  %v419_v16 = vld [vmem:[#allocation7 + $0x28] sm:$0xff]  }
  0x3d   :  { %v68_v15 = vld [vmem:[#allocation3] sm:$0xff]  ;;  %v420_v18 = vld [vmem:[#allocation7 + $0x30] sm:$0xff]  }
  0x3e   :  { %v69_v17 = vpack.c.bf16 %v68_v15, %v68_v15  ;;  %v421_v19 = vld [vmem:[#allocation7 + $0x38] sm:$0xff]   ;;  %v321_v20 = vld [vmem:[%s598_s2] ss:$0 sm:$0xff] }
  0x3f   :  { %362 = vmatpush3.bf16.msra.mxu0 %v407_v3  ;;  %382 = vmatpush3.bf16.msra.mxu1 %v415_v7  ;;  %v330_v28 = vld [vmem:[%s600_s4] ss:$0 sm:$0xff] }
  0x40   :  { %363 = vmatprep.subr.bf16.mxu0 %v497_v1  ;;  %383 = vmatprep.subr.bf16.mxu1 %v497_v1  ;;  %v339_v33 = vld [vmem:[%s601_s5] ss:$0 sm:$0xff] }
  0x41   :  { %v340_v37 = vld [vmem:[#allocation2] ss:$0 sm:$0xff] }
  0x43   :  { %364 = vmatpush3.bf16.msra.mxu0 %v408_v4  ;;  %384 = vmatpush3.bf16.msra.mxu1 %v416_v9 }
  0x44   :  { %365 = vmatprep.subr.bf16.mxu0 %v497_v1  ;;  %385 = vmatprep.subr.bf16.mxu1 %v497_v1 }
  0x47   :  { %366 = vmatpush3.bf16.msra.mxu0 %v409_v6  ;;  %386 = vmatpush3.bf16.msra.mxu1 %v417_v11 }
  0x48   :  { %367 = vmatprep.subr.bf16.mxu0 %v497_v1  ;;  %387 = vmatprep.subr.bf16.mxu1 %v497_v1 }
  0x4b   :  { %368 = vmatpush3.bf16.msra.mxu0 %v410_v8  ;;  %388 = vmatpush3.bf16.msra.mxu1 %v418_v13 }
  0x4c   :  { %369 = vmatprep.subr.bf16.mxu0 %v497_v1  ;;  %389 = vmatprep.subr.bf16.mxu1 %v497_v1 }
  0x4f   :  { %370 = vmatpush3.bf16.msra.mxu0 %v411_v10  ;;  %390 = vmatpush3.bf16.msra.mxu1 %v419_v16 }
  0x50   :  { %371 = vmatprep.subr.bf16.mxu0 %v497_v1  ;;  %391 = vmatprep.subr.bf16.mxu1 %v497_v1 }
  0x53   :  { %372 = vmatpush3.bf16.msra.mxu0 %v412_v12  ;;  %392 = vmatpush3.bf16.msra.mxu1 %v420_v18 }
  0x54   :  { %373 = vmatprep.subr.bf16.mxu0 %v497_v1  ;;  %393 = vmatprep.subr.bf16.mxu1 %v497_v1 }
  0x57   :  { %374 = vmatpush3.bf16.msra.mxu0 %v413_v14  ;;  %394 = vmatpush3.bf16.msra.mxu1 %v421_v19 }
  0x5a   :  { %376 = vmatmul.mubr.bf16.vlgmr.msra.gmra.mrb[0].mxu0 %v69_v17 }
 0x12d   :  { %v175_v21 = vpop.f32.mrb[0].mxu0 }
 0x12e   :  { %v176_v22 = vadd.f32 %v321_v20, %v175_v21  ;;  %v377_v23 = vpop.f32.mrb[1].mxu0 }
 0x12f   :  { %v178_v24 = vpop.f32.mrb[2].mxu0 }
 0x130   :  { %v181_v25 = vmax.f32 %v176_v22, 0.0  ;;  %v378_v26 = vpop.f32.mrb[3].mxu0 }
 0x132   :  { %v182_v27 = vpack.c.bf16 %v181_v25, %v181_v25 }
 0x134   :  { %396 = vmatmul.mubr.bf16.vlgmr.msra.gmra.mrb[0].mxu1 %v182_v27 }
 0x207   :  { %v288_v29 = vpop.f32.mrb[0].mxu1 }
 0x208   :  { %v289_v30 = vadd.f32 %v330_v28, %v288_v29  ;;  %v397_v31 = vpop.f32.mrb[1].mxu1 }
 0x209   :  { %v291_v32 = vpop.f32.mrb[2].mxu1 }
 0x20a   :  { %v294_v34 = vmax.f32 %v289_v30, 0.0  ;;  %v398_v35 = vpop.f32.mrb[3].mxu1 }
 0x20c   :  { %v302_v36 = vmul.f32 %v339_v33, %v294_v34 }
 0x20e   :  { %303 = vadd.xlane.f32.xlu0 %v302_v36 }
 0x29b   :  { %v304_v38 = vpop.xlane.xlu0 %303 }
 0x29c   :  { %v312_v39 = vadd.f32 %v340_v37, %v304_v38 }
 0x29e   :  { %314 = vst.msk [vmem:[%s603_s7] sm:$0xff] %vm313_vm1, %v312_v39 }
 0x29f   :  { %319 = vsyncpa [#allocation4], 1 }
 0x2a0   :  { %320 = vsyncpa [#allocation6], 1 }

</bundles_post_ra>
